<compile_context>
chip_gen: v5e
topology: v5e:2x2
jax: 0.10.0
libtpu: 0.0.40
codegen_flags: <defaults>
</compile_context>

<pallas_src>
import jax
import jax.numpy as jnp
from jax.experimental import pallas as pl
from jax.experimental.pallas import tpu as pltpu


_LANES = 128


def _round_up(x, m):
    return ((x + m - 1) // m) * m


def _row_align(itemsize):
    # Sublane packing: f32 packs 8 rows/vreg, bf16 16, int8 32.
    return {1: 32, 2: 16, 4: 8}.get(itemsize, 8)


def _choose_block_rows(rows_total, itemsize):
    """Rows per block: ~2 MiB per input block (x2 inputs x2 pipeline buffers
    => ~8 MiB VMEM incl. sublane padding, well inside v7x's 64 MiB/TC and the
    32 MiB scoped limit).  Blocks this size already sit at ~HBM roofline, so
    there is no value in scaling them further."""
    align = _row_align(itemsize)
    target = max((2 * 1024 * 1024) // (_LANES * itemsize), align)
    if target >= rows_total:
        return rows_total                    # single full-extent block
    return max((target // align) * align, align)


def _make_kernel(block_rows, rows_total, num_k, need_mask):
    def kernel(pred_ref, target_ref, inter_ref, pt_ref):
        k = pl.program_id(1)

        # Per-sample accumulator init on the first row-block.
        @pl.when(k == 0)
        def _init():
            inter_ref[...] = jnp.zeros_like(inter_ref)
            pt_ref[...] = jnp.zeros_like(pt_ref)

        p = pred_ref[...].astype(jnp.float32)     # (1, block_rows, 128)
        t = target_ref[...].astype(jnp.float32)   # (1, block_rows, 128)

        def accum(p_, t_):
            # Sublane-direction reduction only: bulk is plain VPU adds into a
            # single-vreg-wide accumulator; no cross-lane work in the hot
            # loop and no full-width accumulator read-modify-write.
            inter_ref[...] += jnp.sum(p_ * t_, axis=1, keepdims=True)
            pt_ref[...] += jnp.sum(p_ + t_, axis=1, keepdims=True)

        if need_mask:
            # Only the final row-block is ragged; pay the mask there only.
            rows_in_last = rows_total - (num_k - 1) * block_rows

            @pl.when(k == num_k - 1)
            def _tail():
                row = jax.lax.broadcasted_iota(jnp.int32, p.shape, 1)
                valid = row < rows_in_last
                accum(jnp.where(valid, p, 0.0), jnp.where(valid, t, 0.0))

            @pl.when(k != num_k - 1)
            def _body():
                accum(p, t)
        else:
            accum(p, t)

    return kernel


@jax.jit
def dice_loss(pred, target):
    assert pred.shape == target.shape
    n = pred.shape[0]

    # Zero-copy flatten; keep native dtype (no wrapper upcast).
    pred_f = pred.reshape(n, -1)
    target_f = target.reshape(n, -1)
    f = pred_f.shape[1]

    # Lane-pad the feature dim only when F % 128 != 0 (zeros do not change
    # any of the sums).
    # TODO(synk): replace this (rare) pad-copy with an in-kernel lane mask on
    # the final block to stay strictly zero-copy when F % 128 != 0.
    f_pad = _round_up(max(f, 1), _LANES)
    if f_pad != f:
        pred_f = jnp.pad(pred_f, ((0, 0), (0, f_pad - f)))
        target_f = jnp.pad(target_f, ((0, 0), (0, f_pad - f)))

    # Dense-sublane 3D view: (N, R, 128); zero-copy when no pad was needed.
    rows = f_pad // _LANES
    pred_3d = pred_f.reshape(n, rows, _LANES)
    target_3d = target_f.reshape(n, rows, _LANES)

    itemsize = max(jnp.dtype(pred.dtype).itemsize,
                   jnp.dtype(target.dtype).itemsize)
    block_rows = _choose_block_rows(rows, itemsize)
    num_k = pl.cdiv(rows, block_rows)
    need_mask = (num_k * block_rows) != rows

    kernel = _make_kernel(block_rows, rows, num_k, need_mask)

    out_shapes = (
        jax.ShapeDtypeStruct((n, 1, _LANES), jnp.float32),  # per-lane sum(p*t)
        jax.ShapeDtypeStruct((n, 1, _LANES), jnp.float32),  # per-lane sum(p)+sum(t)
    )

    grid_spec = pltpu.PrefetchScalarGridSpec(
        num_scalar_prefetch=0,
        # Sample axis first ("parallel": both v7x TensorCores get work for
        # N >= 2; a plain serial loop on v5e/v6e); reduction axis last.
        # TODO(synk): for N == 1 on v7x, additionally split the row-block axis
        # so the second TensorCore is not idle.
        grid=(n, num_k),
        in_specs=[
            pl.BlockSpec((1, block_rows, _LANES), lambda i, k: (i, k, 0)),
            pl.BlockSpec((1, block_rows, _LANES), lambda i, k: (i, k, 0)),
        ],
        out_specs=[
            pl.BlockSpec((1, 1, _LANES), lambda i, k: (i, 0, 0)),
            pl.BlockSpec((1, 1, _LANES), lambda i, k: (i, 0, 0)),
        ],
    )

    inter_l, pt_l = pl.pallas_call(
        kernel,
        out_shape=out_shapes,
        grid_spec=grid_spec,
        compiler_params=pltpu.CompilerParams(
            dimension_semantics=("parallel", "arbitrary"),
            vmem_limit_bytes=32 * 1024 * 1024,
        ),
        cost_estimate=pl.CostEstimate(
            flops=4 * n * f_pad,
            transcendentals=0,
            bytes_accessed=2 * n * f_pad * itemsize + 2 * n * _LANES * 4,
        ),
    )(pred_3d, target_3d)

    # Tiny XLA finalize: fold the 128 per-lane partials, compute dice loss.
    inter = jnp.sum(inter_l[:, 0, :], axis=-1)   # (N,)  sum(p*t)
    pt = jnp.sum(pt_l[:, 0, :], axis=-1)         # (N,)  sum(p) + sum(t)

    smooth = jnp.float32(1.0)
    dice = (2.0 * inter + smooth) / (pt + smooth)
    return 1.0 - jnp.sum(dice) / jnp.float32(n)


def _dice_loss_ref(pred, target):
    smooth = 1.0
    n = pred.shape[0]
    p = pred.reshape(n, -1).astype(jnp.float32)
    t = target.reshape(n, -1).astype(jnp.float32)
    inter = (p * t).sum(1)
    dice = (2.0 * inter + smooth) / (p.sum(1) + t.sum(1) + smooth)
    return 1.0 - dice.sum() / n


if __name__ == "__main__":
    key = jax.random.PRNGKey(0)
    k1, k2 = jax.random.split(key)

    # NCHW inputs, like the PyTorch module would receive.
    pred = jax.nn.sigmoid(jax.random.normal(k1, (2, 4, 16, 16), jnp.float32))
    target = (jax.random.uniform(k2, (2, 4, 16, 16)) > 0.5).astype(jnp.float32)

    loss = jax.block_until_ready(dice_loss(pred, target))

    ref = _dice_loss_ref(pred, target)
    assert jnp.allclose(loss, ref, rtol=1e-5, atol=1e-5), (loss, ref)

    print("KERNEL_OK")
</pallas_src>

<mosaic_0001>
module attributes {stable_mosaic.version = 11 : i64} {
  func.func @kernel(%arg0: i32, %arg1: i32, %arg2: memref<1x8x128xf32, #tpu.memory_space<vmem>>, %arg3: memref<1x8x128xf32, #tpu.memory_space<vmem>>, %arg4: memref<1x1x128xf32, #tpu.memory_space<vmem>>, %arg5: memref<1x1x128xf32, #tpu.memory_space<vmem>>) attributes {dimension_semantics = [#tpu.dimension_semantics<parallel>, #tpu.dimension_semantics<arbitrary>], iteration_bounds = array<i64: 2, 1>, scalar_prefetch = 0 : i64, scratch_operands = 0 : i64, tpu.core_type = #tpu.core_type<tc>, window_params = [{transform_indices = @transform_0, window_bounds = array<i64: 1, 8, 128>}, {transform_indices = @transform_1, window_bounds = array<i64: 1, 8, 128>}, {transform_indices = @transform_2, window_bounds = array<i64: 1, 1, 128>}, {transform_indices = @transform_3, window_bounds = array<i64: 1, 1, 128>}]} {
    %c0_i32 = arith.constant 0 : i32
    %0 = arith.cmpi eq, %arg1, %c0_i32 : i32
    %1 = arith.extui %0 : i1 to i32
    %c0_i32_0 = arith.constant 0 : i32
    %2 = arith.cmpi ne, %1, %c0_i32_0 : i32
    scf.if %2 {
      %cst_19 = arith.constant 0.000000e+00 : f32
      %17 = vector.broadcast %cst_19 : f32 to vector<1x1x128xf32>
      %c0_20 = arith.constant 0 : index
      %c0_21 = arith.constant 0 : index
      %c0_22 = arith.constant 0 : index
      %18 = vector.load %arg4[%c0_20, %c0_21, %c0_22] : memref<1x1x128xf32, #tpu.memory_space<vmem>>, vector<1x1x128xf32>
      tpu.vector_store %arg4[%c0_20, %c0_21, %c0_22], %17 {strides = array<i32>} : memref<1x1x128xf32, #tpu.memory_space<vmem>>, vector<1x1x128xf32>,
      %cst_23 = arith.constant 0.000000e+00 : f32
      %19 = vector.broadcast %cst_23 : f32 to vector<1x1x128xf32>
      %c0_24 = arith.constant 0 : index
      %c0_25 = arith.constant 0 : index
      %c0_26 = arith.constant 0 : index
      %20 = vector.load %arg5[%c0_24, %c0_25, %c0_26] : memref<1x1x128xf32, #tpu.memory_space<vmem>>, vector<1x1x128xf32>
      tpu.vector_store %arg5[%c0_24, %c0_25, %c0_26], %19 {strides = array<i32>} : memref<1x1x128xf32, #tpu.memory_space<vmem>>, vector<1x1x128xf32>,
    } else {
    }
    %c0 = arith.constant 0 : index
    %c0_1 = arith.constant 0 : index
    %c0_2 = arith.constant 0 : index
    %3 = vector.load %arg2[%c0, %c0_1, %c0_2] : memref<1x8x128xf32, #tpu.memory_space<vmem>>, vector<1x8x128xf32>
    %c0_3 = arith.constant 0 : index
    %c0_4 = arith.constant 0 : index
    %c0_5 = arith.constant 0 : index
    %4 = vector.load %arg3[%c0_3, %c0_4, %c0_5] : memref<1x8x128xf32, #tpu.memory_space<vmem>>, vector<1x8x128xf32>
    %c0_6 = arith.constant 0 : index
    %c0_7 = arith.constant 0 : index
    %c0_8 = arith.constant 0 : index
    %5 = vector.load %arg4[%c0_6, %c0_7, %c0_8] : memref<1x1x128xf32, #tpu.memory_space<vmem>>, vector<1x1x128xf32>
    %6 = arith.mulf %3, %4 : vector<1x8x128xf32>
    %cst = arith.constant dense<0.000000e+00> : vector<1x128xf32>
    %7 = vector.multi_reduction <add>, %6, %cst [1] : vector<1x8x128xf32> to vector<1x128xf32>
    %8 = vector.shape_cast %7 : vector<1x128xf32> to vector<1x1x128xf32>
    %9 = arith.addf %5, %8 : vector<1x1x128xf32>
    %c0_9 = arith.constant 0 : index
    %c0_10 = arith.constant 0 : index
    %c0_11 = arith.constant 0 : index
    %10 = vector.load %arg4[%c0_9, %c0_10, %c0_11] : memref<1x1x128xf32, #tpu.memory_space<vmem>>, vector<1x1x128xf32>
    tpu.vector_store %arg4[%c0_9, %c0_10, %c0_11], %9 {strides = array<i32>} : memref<1x1x128xf32, #tpu.memory_space<vmem>>, vector<1x1x128xf32>,
    %c0_12 = arith.constant 0 : index
    %c0_13 = arith.constant 0 : index
    %c0_14 = arith.constant 0 : index
    %11 = vector.load %arg5[%c0_12, %c0_13, %c0_14] : memref<1x1x128xf32, #tpu.memory_space<vmem>>, vector<1x1x128xf32>
    %12 = arith.addf %3, %4 : vector<1x8x128xf32>
    %cst_15 = arith.constant dense<0.000000e+00> : vector<1x128xf32>
    %13 = vector.multi_reduction <add>, %12, %cst_15 [1] : vector<1x8x128xf32> to vector<1x128xf32>
    %14 = vector.shape_cast %13 : vector<1x128xf32> to vector<1x1x128xf32>
    %15 = arith.addf %11, %14 : vector<1x1x128xf32>
    %c0_16 = arith.constant 0 : index
    %c0_17 = arith.constant 0 : index
    %c0_18 = arith.constant 0 : index
    %16 = vector.load %arg5[%c0_16, %c0_17, %c0_18] : memref<1x1x128xf32, #tpu.memory_space<vmem>>, vector<1x1x128xf32>
    tpu.vector_store %arg5[%c0_16, %c0_17, %c0_18], %15 {strides = array<i32>} : memref<1x1x128xf32, #tpu.memory_space<vmem>>, vector<1x1x128xf32>,
    return
  }
  func.func @transform_0(%arg0: i32, %arg1: i32) -> (i32, i32, i32) {
    %c0_i32 = arith.constant 0 : i32
    %c0_i32_0 = arith.constant 0 : i32
    return %arg0, %arg1, %c0_i32 : i32, i32, i32
  }
  func.func @transform_1(%arg0: i32, %arg1: i32) -> (i32, i32, i32) {
    %c0_i32 = arith.constant 0 : i32
    %c0_i32_0 = arith.constant 0 : i32
    return %arg0, %arg1, %c0_i32 : i32, i32, i32
  }
  func.func @transform_2(%arg0: i32, %arg1: i32) -> (i32, i32, i32) {
    %c0_i32 = arith.constant 0 : i32
    %c0_i32_0 = arith.constant 0 : i32
    %c0_i32_1 = arith.constant 0 : i32
    return %arg0, %c0_i32, %c0_i32_0 : i32, i32, i32
  }
  func.func @transform_3(%arg0: i32, %arg1: i32) -> (i32, i32, i32) {
    %c0_i32 = arith.constant 0 : i32
    %c0_i32_0 = arith.constant 0 : i32
    %c0_i32_1 = arith.constant 0 : i32
    return %arg0, %c0_i32, %c0_i32_0 : i32, i32, i32
  }
}

</mosaic_0001>

<bundles_post_ra>
// kernel: dice_loss.1
= control target key start
LH: loop header
LB: loop body
LE: loop exit
PB: predicated region body
PF: predicated region fallthrough
CT: control target
= control target key end

     0   :  { %s429_s12 = smov 0   ;;  %s431_s13 = smov 0   ;;  %s468_s0 = inlined_call_operand.vmem [shape: f32[2,8,128], index: 0, kind: input, shape index: {}]   ;;  %s469_s1 = inlined_call_operand.vmem [shape: f32[2,8,128], index: 1, kind: input, shape index: {}]   ;;  %s470_s2 = inlined_call_operand.vmem [shape: f32[2,1,128], index: 2, kind: output, shape index: {0}]   ;;  %s471_s3 = inlined_call_operand.vmem [shape: f32[2,1,128], index: 3, kind: output, shape index: {1}]  }
   0x1   :  { %s433_s14 = smov 0  }
   0x2 LB: > { %s26_s15 = sadd.s32 1, %s402_s13  ;;  %p354_p0 = scmp.ge.s32.totalorder %s406_s14, 1  ;;  %s406_s14 = sphi %s433_s14, %s14_s14   ;;  %s402_s13 = sphi %s431_s13, %s473_s13   ;;  %s398_s12 = sphi %s429_s12, %s472_s12  }
   0x3   : > { %p28_p1 = scmp.ge.s32.totalorder %s26_s15, 2  ;;  %p170_p2 = scmp.lt.s32.totalorder %s406_s14, 3 }
   0x5   : > { %s475_s15 = smov (%p28_p1, %s26_s15), 0  ;;  %p171_p3 = pnand %p354_p0, %p170_p2 }
   0x6   : > { %p204_p4 = scmp.lt.s32.totalorder (!%p171_p3), %s398_s12, 1 }
   0x7   : > { %174 = sbr.rel (%p171_p3) target bundleno = 35 (0x23), region = 28 }
   0xc   : > { %s477_s12 = smov (!%p204_p4, %s398_s12), 1  ;;  %v408_v0 = vmov 0.0  }
   0xd   : > { %s355_s16 = sshll.u32 %s477_s12, 3  ;;  %s220_s19 = scalar_lea.vmem %s470_s2, %s477_s12 }
   0xe   : > { %s210_s22 = scalar_lea.vmem %s468_s0, %s355_s16  ;;  %s217_s25 = scalar_lea.vmem %s469_s1, %s355_s16  ;;  %228 = vst [vmem:[%s220_s19] sm:$0x1] %v408_v0 }
   0xf   : > { %v230_v1 = vld [vmem:[%s210_s22] sm:$0xff]  ;;  %s223_s28 = scalar_lea.vmem %s471_s3, %s477_s12 }
  0x10   : > { %v231_v2 = vld [vmem:[%s217_s25] sm:$0xff]  ;;  %229 = vst [vmem:[%s223_s28] sm:$0x1] %v408_v0 }
  0x11   : > { %v233_v3 = vmul.f32 %v231_v2, %v230_v1  ;;  %v243_v4 = vadd.f32 %v231_v2, %v230_v1 }
  0x13   : > { %v234_v5 = vrot.slane %v233_v3, 4  ;;  %v244_v6 = vrot.slane %v243_v4, 4 }
  0x15   : > { %v235_v7 = vadd.f32 %v234_v5, %v233_v3  ;;  %v245_v8 = vadd.f32 %v244_v6, %v243_v4  ;;  %v232_v15 = vld [vmem:[%s220_s19] sm:$0x1] }
  0x17   : > { %v236_v9 = vrot.slane %v235_v7, 2  ;;  %v246_v10 = vrot.slane %v245_v8, 2  ;;  %v242_v16 = vld [vmem:[%s223_s28] sm:$0x1] }
  0x19   : > { %v237_v11 = vadd.f32 %v236_v9, %v235_v7  ;;  %v247_v12 = vadd.f32 %v246_v10, %v245_v8 }
  0x1b   : > { %v238_v13 = vrot.slane %v237_v11, 1  ;;  %v248_v14 = vrot.slane %v247_v12, 1 }
  0x1d   : > { %v239_v17 = vadd.f32 %v238_v13, %v237_v11  ;;  %v249_v18 = vadd.f32 %v248_v14, %v247_v12 }
  0x1f   : > { %v240_v19 = vadd.f32 %v239_v17, %v232_v15  ;;  %v250_v20 = vadd.f32 %v249_v18, %v242_v16 }
  0x21   : > { %241 = vst [vmem:[%s220_s19] sm:$0x1] %v240_v19 }
  0x22   : > { %251 = vst [vmem:[%s223_s28] sm:$0x1] %v250_v20 }
  0x23 PF: > { %s14_s14 = sadd.s32 1, %s406_s14   ;;  %s472_s12 = smov %s402_s13 }
  0x24   : > { %p11_p5 = scmp.ge.s32.totalorder %s14_s14, 4   ;;  %s473_s13 = smov %s475_s15 }
  0x26   :  { %13 = sbr.rel (!%p11_p5) target bundleno = 2 (0x2), region = 77 }

</bundles_post_ra>
